<compile_context>
chip_gen: v7x
topology: tpu7x:2x2x1
jax: 0.10.0
libtpu: 0.0.40
codegen_flags: <defaults>
</compile_context>

<pallas_src>
import functools

import jax
import jax.numpy as jnp
from jax.experimental import pallas as pl
from jax.experimental.pallas import tpu as pltpu

LANE = 128
ACC_SUBLANES = 8
MAX_TILE_ROWS = 4096   # 4096 x 128 x 4B = 2 MiB/tile (f32); 2 in x 2 buf = 8 MiB


def _num_tensorcores():
    """TensorCores per chip: 2 on v7x, 1 on v5e/v6e. Defensive probe; 1 is always safe."""
    try:
        info = pltpu.get_tpu_info()
        for attr in ("num_cores", "num_tensorcores", "tensorcores_per_chip",
                     "cores_per_chip"):
            v = getattr(info, attr, None)
            if isinstance(v, int) and v >= 1:
                return max(1, min(int(v), 2))
    except Exception:
        pass
    try:
        dev = jax.devices()[0]
        kind = str(getattr(dev, "device_kind", "")).lower()
        if "v7" in kind or "tpu7" in kind:
            return 2
        v = getattr(dev, "num_cores", None)
        if isinstance(v, int) and v >= 1:
            return max(1, min(int(v), 2))
    except Exception:
        pass
    return 1


# ----------------------------------------------------------------------------
# Fused kernel: tiled MSE reduction + SVDD finalize
# ----------------------------------------------------------------------------
def _fused_kernel(a_ref, b_ref, phi_ref, rp_ref, svdd_ref, *,
                  rows_valid, tile_rows, steps_per_core, first_masked_blk,
                  needs_row_mask, compute_svdd, gate_svdd_to_core0,
                  eps, temperature):
    core = pl.program_id(0)
    i = pl.program_id(1)
    blk = core * steps_per_core + i          # logical (unclamped) block index

    @pl.when(i == 0)
    def _init():
        # rp_ref / svdd_ref block index is (core, 0): constant across the
        # "arbitrary" axis, so both stay VMEM-resident -> accumulate in place.
        rp_ref[...] = jnp.zeros_like(rp_ref)
        svdd_ref[...] = jnp.zeros_like(svdd_ref)

    # Cast in-kernel: HBM traffic stays at the inputs' native (e.g. bf16) width.
    d = a_ref[...].astype(jnp.float32) - b_ref[...].astype(jnp.float32)
    sq = d * d

    def _accumulate(vals):
        # Fold sublane groups into the (8,128) vector accumulator: pure VPU
        # adds per step; the single cross-lane reduce happens in the wrapper.
        rp_ref[...] += vals.reshape(
            tile_rows // ACC_SUBLANES, ACC_SUBLANES, LANE).sum(axis=0)

    if needs_row_mask:
        # Mask only tiles that can overshoot (partial last block and any
        # clamped-duplicate blocks); interior tiles skip the iota/select.
        @pl.when(blk < first_masked_blk)
        def _interior():
            _accumulate(sq)

        @pl.when(blk >= first_masked_blk)
        def _edge():
            row = blk * tile_rows + jax.lax.broadcasted_iota(
                jnp.int32, (tile_rows, 1), 0)
            # jnp.where SELECTS the garbage (possibly NaN) OOB data away.
            _accumulate(jnp.where(row < rows_valid, sq, 0.0))
    else:
        _accumulate(sq)

    @pl.when(i == steps_per_core - 1)
    def _finalize():
        if compute_svdd:
            def _svdd_body():
                phi = phi_ref[...].astype(jnp.float32)            # (B, D)
                B = phi.shape[0]
                nb = B // 2
                rid = jax.lax.broadcasted_iota(jnp.int32, (B, 1), 0)
                # c = mean over second half of the batch (first-call buffer
                # init: ones * mean). Masked sum avoids a sublane-slice
                # relayout when nb is not a multiple of 8.
                half = (rid >= nb).astype(jnp.float32)
                c = jnp.sum(phi * half, axis=0, keepdims=True) * (1.0 / nb)
                small = jnp.abs(c) < eps
                c = jnp.where(small & (c < 0), -eps, c)
                c = jnp.where(small & (c > 0), eps, c)
                # per-sample mean squared distance to c
                z = jnp.mean((phi - c) ** 2, axis=1, keepdims=True)   # (B, 1)
                # first half: (z + 1e-6)**(-1) * temperature ; second half: z
                z = jnp.where(rid < nb, temperature / (z + 1e-6), z)
                svdd_ref[...] = jnp.zeros_like(svdd_ref) + jnp.mean(z)

            if gate_svdd_to_core0:
                # v7x: only core 0 runs the XLU/divide-heavy epilogue; the
                # other core's wall time is pure streaming.
                pl.when(core == 0)(_svdd_body)
            else:
                _svdd_body()


# ----------------------------------------------------------------------------
# Wrapper
# ----------------------------------------------------------------------------
def mse_svdd_fused(yhat, y, phi, *, compute_svdd, eps, temperature, ncores=None):
    n = yhat.size
    if n % LANE == 0:
        rows = n // LANE
        a2 = yhat.reshape(rows, LANE)       # free reshape, no pad / no cast
        b2 = y.reshape(rows, LANE)
    else:
        # Rare non-128-divisible element count: pad both with identical zeros
        # (diff == 0 there, so the sum is unchanged and 1/n stays correct).
        rows = -(-n // LANE)
        pad = rows * LANE - n
        a2 = jnp.pad(yhat.reshape(-1), (0, pad)).reshape(rows, LANE)
        b2 = jnp.pad(y.reshape(-1), (0, pad)).reshape(rows, LANE)

    if ncores is None:
        ncores = _num_tensorcores()

    # Tile choice: biggest lane-dense tile up to 4096 rows (2 MiB f32);
    # 2 inputs x 2 pipeline buffers = 8 MiB, inside every chip's scoped budget.
    per_core = -(-rows // ncores)
    tile_rows = min(MAX_TILE_ROWS, per_core)
    tile_rows = max(-(-tile_rows // ACC_SUBLANES) * ACC_SUBLANES, ACC_SUBLANES)

    total_blocks = -(-rows // tile_rows)
    ncores_used = max(1, min(ncores, total_blocks))
    steps_per_core = -(-total_blocks // ncores_used)
    covered = ncores_used * steps_per_core * tile_rows
    needs_row_mask = covered > rows
    first_masked_blk = rows // tile_rows     # first logical block needing a mask
    max_block = total_blocks - 1

    def ab_index_map(c, i):
        blk = c * steps_per_core + i
        # Clamp so DMAs always target a valid block; clamped/partial blocks are
        # fully zeroed in-kernel via the logical-row mask.
        return (jnp.minimum(blk, max_block), 0)

    B, D = phi.shape
    # TODO(synk): for very large B*D, tile phi over D with a sum-then-correct
    # formulation for c instead of a single resident VMEM block.

    kern = functools.partial(
        _fused_kernel,
        rows_valid=rows, tile_rows=tile_rows, steps_per_core=steps_per_core,
        first_masked_blk=first_masked_blk, needs_row_mask=needs_row_mask,
        compute_svdd=compute_svdd, gate_svdd_to_core0=(ncores_used > 1),
        eps=float(eps), temperature=float(temperature))

    rp_parts, svdd_parts = pl.pallas_call(
        kern,
        out_shape=(
            jax.ShapeDtypeStruct((ncores_used * ACC_SUBLANES, LANE), jnp.float32),
            jax.ShapeDtypeStruct((ncores_used * ACC_SUBLANES, LANE), jnp.float32),
        ),
        grid_spec=pltpu.PrefetchScalarGridSpec(
            num_scalar_prefetch=0,
            grid=(ncores_used, steps_per_core),
            in_specs=[
                pl.BlockSpec((tile_rows, LANE), ab_index_map),
                pl.BlockSpec((tile_rows, LANE), ab_index_map),
                pl.BlockSpec((B, D), lambda c, i: (0, 0)),   # phi resident in VMEM
            ],
            out_specs=[
                pl.BlockSpec((ACC_SUBLANES, LANE), lambda c, i: (c, 0)),
                pl.BlockSpec((ACC_SUBLANES, LANE), lambda c, i: (c, 0)),
            ],
        ),
        compiler_params=pltpu.CompilerParams(
            dimension_semantics=("parallel", "arbitrary"),
            vmem_limit_bytes=32 * 1024 * 1024,
        ),
    )(a2, b2, phi)

    rp = jnp.sum(rp_parts) * (1.0 / float(n))
    svdd = svdd_parts[0, 0]     # written by core 0 only
    return rp, svdd


# ----------------------------------------------------------------------------
# SVDDLoss.forward
# ----------------------------------------------------------------------------
def svdd_loss(out, y, *, beta=1.0, temperature=0.1, eps=0.1, ncores=None):
    yhat, phi = out
    # TODO(synk): OCBase._interp (F.interpolate bilinear/trilinear, align_corners=True)
    # not implemented; spatial shapes must already match (identity path).
    assert tuple(y.shape[2:]) == tuple(yhat.shape[2:])
    assert phi.shape[0] % 2 == 0, "SVDD loss assumes an even batch (nb = B // 2)"
    # TODO(synk): OCBase._loss is abstract in the reference module; MSE is used
    # here as the reconstruction loss.
    # NOTE: beta must be a Python float (static branch), mirroring the module attr.
    compute_svdd = beta >= 0
    rp, svdd = mse_svdd_fused(yhat, y, phi, compute_svdd=compute_svdd,
                              eps=eps, temperature=temperature, ncores=ncores)
    if compute_svdd:
        return svdd + beta * rp
    return rp


# ----------------------------------------------------------------------------
# Pure-JAX reference (mirrors the PyTorch code path) for a sanity check.
# ----------------------------------------------------------------------------
def _ref_loss(yhat, phi, y, beta, temperature, eps):
    rp = jnp.mean((yhat - y) ** 2)
    nb = phi.shape[0] // 2
    c = jnp.mean(phi[nb:], axis=0, keepdims=True)
    small = jnp.abs(c) < eps
    c = jnp.where(small & (c < 0), -eps, c)
    c = jnp.where(small & (c > 0), eps, c)
    z = jnp.mean((phi - c) ** 2, axis=1)
    z = z.at[:nb].add(1e-6)
    yi = jnp.concatenate([-jnp.ones(nb), jnp.ones(nb)]).astype(jnp.float32)
    z = z ** yi
    z = z.at[:nb].multiply(temperature)
    return jnp.mean(z) + beta * rp


if __name__ == "__main__":
    key = jax.random.PRNGKey(0)
    k1, k2, k3 = jax.random.split(key, 3)

    nb, C, H, W = 2, 4, 16, 16       # batch = 2*nb = 4 (first half "anomalous")
    D = 128                          # feature size sz of the SVDD center buffer

    yhat = jax.random.normal(k1, (2 * nb, C, H, W), dtype=jnp.float32)
    y = jax.random.normal(k2, (2 * nb, C, H, W), dtype=jnp.float32)
    phi = jax.random.normal(k3, (2 * nb, D), dtype=jnp.float32)

    loss = svdd_loss((yhat, phi), y, beta=1.0, temperature=0.1, eps=0.1)
    loss = jax.block_until_ready(loss)

    ref = _ref_loss(yhat, phi, y, 1.0, 0.1, 0.1)
    assert jnp.allclose(loss, ref, rtol=1e-5, atol=1e-6), (loss, ref)

    print("KERNEL_OK")
</pallas_src>

<mosaic_0001>
module attributes {stable_mosaic.version = 11 : i64} {
  func.func @_fused_kernel(%arg0: i32, %arg1: i32, %arg2: memref<32x128xf32, #tpu.memory_space<vmem>>, %arg3: memref<32x128xf32, #tpu.memory_space<vmem>>, %arg4: memref<4x128xf32, #tpu.memory_space<vmem>>, %arg5: memref<8x128xf32, #tpu.memory_space<vmem>>, %arg6: memref<8x128xf32, #tpu.memory_space<vmem>>) attributes {dimension_semantics = [#tpu.dimension_semantics<parallel>, #tpu.dimension_semantics<arbitrary>], iteration_bounds = array<i64: 1, 1>, scalar_prefetch = 0 : i64, scratch_operands = 0 : i64, tpu.core_type = #tpu.core_type<tc>, window_params = [{transform_indices = @transform_0, window_bounds = array<i64: 32, 128>}, {transform_indices = @transform_1, window_bounds = array<i64: 32, 128>}, {pipeline_mode = #tpu.pipeline_mode<synchronous>, transform_indices = @transform_2, window_bounds = array<i64: 4, 128>}, {transform_indices = @transform_3, window_bounds = array<i64: 8, 128>}, {transform_indices = @transform_4, window_bounds = array<i64: 8, 128>}]} {
    %c0_i32 = arith.constant 0 : i32
    %0 = arith.cmpi eq, %arg1, %c0_i32 : i32
    %1 = arith.extui %0 : i1 to i32
    %c0_i32_0 = arith.constant 0 : i32
    %2 = arith.cmpi ne, %1, %c0_i32_0 : i32
    scf.if %2 {
      %cst_10 = arith.constant 0.000000e+00 : f32
      %15 = vector.broadcast %cst_10 : f32 to vector<8x128xf32>
      %c0_11 = arith.constant 0 : index
      %c0_12 = arith.constant 0 : index
      %16 = vector.load %arg5[%c0_11, %c0_12] : memref<8x128xf32, #tpu.memory_space<vmem>>, vector<8x128xf32>
      tpu.vector_store %arg5[%c0_11, %c0_12], %15 {strides = array<i32>} : memref<8x128xf32, #tpu.memory_space<vmem>>, vector<8x128xf32>,
      %cst_13 = arith.constant 0.000000e+00 : f32
      %17 = vector.broadcast %cst_13 : f32 to vector<8x128xf32>
      %c0_14 = arith.constant 0 : index
      %c0_15 = arith.constant 0 : index
      %18 = vector.load %arg6[%c0_14, %c0_15] : memref<8x128xf32, #tpu.memory_space<vmem>>, vector<8x128xf32>
      tpu.vector_store %arg6[%c0_14, %c0_15], %17 {strides = array<i32>} : memref<8x128xf32, #tpu.memory_space<vmem>>, vector<8x128xf32>,
    } else {
    }
    %c0 = arith.constant 0 : index
    %c0_1 = arith.constant 0 : index
    %3 = vector.load %arg2[%c0, %c0_1] : memref<32x128xf32, #tpu.memory_space<vmem>>, vector<32x128xf32>
    %c0_2 = arith.constant 0 : index
    %c0_3 = arith.constant 0 : index
    %4 = vector.load %arg3[%c0_2, %c0_3] : memref<32x128xf32, #tpu.memory_space<vmem>>, vector<32x128xf32>
    %5 = arith.subf %3, %4 : vector<32x128xf32>
    %6 = arith.mulf %5, %5 : vector<32x128xf32>
    %c0_4 = arith.constant 0 : index
    %c0_5 = arith.constant 0 : index
    %7 = vector.load %arg5[%c0_4, %c0_5] : memref<8x128xf32, #tpu.memory_space<vmem>>, vector<8x128xf32>
    %8 = vector.shape_cast %6 : vector<32x128xf32> to vector<4x8x128xf32>
    %cst = arith.constant dense<0.000000e+00> : vector<8x128xf32>
    %9 = vector.multi_reduction <add>, %8, %cst [0] : vector<4x8x128xf32> to vector<8x128xf32>
    %10 = arith.addf %7, %9 : vector<8x128xf32>
    %c0_6 = arith.constant 0 : index
    %c0_7 = arith.constant 0 : index
    %11 = vector.load %arg5[%c0_6, %c0_7] : memref<8x128xf32, #tpu.memory_space<vmem>>, vector<8x128xf32>
    tpu.vector_store %arg5[%c0_6, %c0_7], %10 {strides = array<i32>} : memref<8x128xf32, #tpu.memory_space<vmem>>, vector<8x128xf32>,
    %c0_i32_8 = arith.constant 0 : i32
    %12 = arith.cmpi eq, %arg1, %c0_i32_8 : i32
    %13 = arith.extui %12 : i1 to i32
    %c0_i32_9 = arith.constant 0 : i32
    %14 = arith.cmpi ne, %13, %c0_i32_9 : i32
    scf.if %14 {
      %c0_10 = arith.constant 0 : index
      %c0_11 = arith.constant 0 : index
      %15 = vector.load %arg4[%c0_10, %c0_11] : memref<4x128xf32, #tpu.memory_space<vmem>>, vector<4x128xf32>
      %16 = tpu.iota {dimensions = array<i32: 0>} : vector<4x1xi32>
      %c2_i32 = arith.constant 2 : i32
      %17 = vector.broadcast %c2_i32 : i32 to vector<4x1xi32>
      %18 = arith.cmpi sge, %16, %17 : vector<4x1xi32>
      %19 = arith.extui %18 : vector<4x1xi1> to vector<4x1xi32>
      %20 = arith.sitofp %19 : vector<4x1xi32> to vector<4x1xf32>
      %21 = vector.broadcast %20 : vector<4x1xf32> to vector<4x128xf32>
      %22 = arith.mulf %15, %21 : vector<4x128xf32>
      %cst_12 = arith.constant dense<0.000000e+00> : vector<128xf32>
      %23 = vector.multi_reduction <add>, %22, %cst_12 [0] : vector<4x128xf32> to vector<128xf32>
      %24 = vector.shape_cast %23 : vector<128xf32> to vector<1x128xf32>
      %cst_13 = arith.constant 5.000000e-01 : f32
      %25 = vector.broadcast %cst_13 : f32 to vector<1x128xf32>
      %26 = arith.mulf %24, %25 : vector<1x128xf32>
      %27 = math.absf %26 : vector<1x128xf32>
      %cst_14 = arith.constant 1.000000e-01 : f32
      %28 = vector.broadcast %cst_14 : f32 to vector<1x128xf32>
      %29 = arith.cmpf olt, %27, %28 : vector<1x128xf32>
      %cst_15 = arith.constant 0.000000e+00 : f32
      %30 = vector.broadcast %cst_15 : f32 to vector<1x128xf32>
      %31 = arith.cmpf olt, %26, %30 : vector<1x128xf32>
      %32 = arith.andi %29, %31 : vector<1x128xi1>
      %cst_16 = arith.constant -1.000000e-01 : f32
      %33 = vector.broadcast %cst_16 : f32 to vector<1x128xf32>
      %34 = arith.select %32, %33, %26 : vector<1x128xi1>, vector<1x128xf32>
      %cst_17 = arith.constant 0.000000e+00 : f32
      %35 = vector.broadcast %cst_17 : f32 to vector<1x128xf32>
      %36 = arith.cmpf ogt, %34, %35 : vector<1x128xf32>
      %37 = arith.andi %29, %36 : vector<1x128xi1>
      %cst_18 = arith.constant 1.000000e-01 : f32
      %38 = vector.broadcast %cst_18 : f32 to vector<1x128xf32>
      %39 = arith.select %37, %38, %34 : vector<1x128xi1>, vector<1x128xf32>
      %40 = vector.broadcast %39 : vector<1x128xf32> to vector<4x128xf32>
      %41 = arith.subf %15, %40 : vector<4x128xf32>
      %42 = arith.mulf %41, %41 : vector<4x128xf32>
      %cst_19 = arith.constant dense<0.000000e+00> : vector<4xf32>
      %43 = vector.multi_reduction <add>, %42, %cst_19 [1] : vector<4x128xf32> to vector<4xf32>
      %44 = vector.shape_cast %43 : vector<4xf32> to vector<4x1xf32>
      %cst_20 = arith.constant 1.280000e+02 : f32
      %45 = vector.broadcast %cst_20 : f32 to vector<4x1xf32>
      %46 = arith.divf %44, %45 : vector<4x1xf32>
      %c2_i32_21 = arith.constant 2 : i32
      %47 = vector.broadcast %c2_i32_21 : i32 to vector<4x1xi32>
      %48 = arith.cmpi slt, %16, %47 : vector<4x1xi32>
      %cst_22 = arith.constant 9.99999997E-7 : f32
      %49 = vector.broadcast %cst_22 : f32 to vector<4x1xf32>
      %50 = arith.addf %46, %49 : vector<4x1xf32>
      %cst_23 = arith.constant 1.000000e-01 : f32
      %51 = vector.broadcast %cst_23 : f32 to vector<4x1xf32>
      %52 = arith.divf %51, %50 : vector<4x1xf32>
      %53 = arith.select %48, %52, %46 : vector<4x1xi1>, vector<4x1xf32>
      %cst_24 = arith.constant 0.000000e+00 : f32
      %54 = vector.broadcast %cst_24 : f32 to vector<8x128xf32>
      %55 = vector.shape_cast %53 : vector<4x1xf32> to vector<1x4x1xf32>
      %cst_25 = arith.constant dense<0.000000e+00> : vector<1xf32>
      %56 = vector.multi_reduction <add>, %55, %cst_25 [1, 2] : vector<1x4x1xf32> to vector<1xf32>
      %57 = vector.shape_cast %56 : vector<1xf32> to vector<1x1x1xf32>
      %58 = vector.extract %57[0, 0, 0] : f32 from vector<1x1x1xf32>
      %cst_26 = arith.constant 4.000000e+00 : f32
      %59 = arith.divf %58, %cst_26 : f32
      %60 = vector.broadcast %59 : f32 to vector<8x128xf32>
      %61 = arith.addf %54, %60 : vector<8x128xf32>
      %c0_27 = arith.constant 0 : index
      %c0_28 = arith.constant 0 : index
      %62 = vector.load %arg6[%c0_27, %c0_28] : memref<8x128xf32, #tpu.memory_space<vmem>>, vector<8x128xf32>
      tpu.vector_store %arg6[%c0_27, %c0_28], %61 {strides = array<i32>} : memref<8x128xf32, #tpu.memory_space<vmem>>, vector<8x128xf32>,
    } else {
    }
    return
  }
  func.func @transform_0(%arg0: i32, %arg1: i32) -> (i32, i32) {
    %c1_i32 = arith.constant 1 : i32
    %0 = arith.muli %arg0, %c1_i32 : i32
    %1 = arith.addi %0, %arg1 : i32
    %c0_i32 = arith.constant 0 : i32
    %2 = arith.minsi %1, %c0_i32 : i32
    %c0_i32_0 = arith.constant 0 : i32
    %c0_i32_1 = arith.constant 0 : i32
    return %2, %c0_i32_0 : i32, i32
  }
  func.func @transform_1(%arg0: i32, %arg1: i32) -> (i32, i32) {
    %c1_i32 = arith.constant 1 : i32
    %0 = arith.muli %arg0, %c1_i32 : i32
    %1 = arith.addi %0, %arg1 : i32
    %c0_i32 = arith.constant 0 : i32
    %2 = arith.minsi %1, %c0_i32 : i32
    %c0_i32_0 = arith.constant 0 : i32
    %c0_i32_1 = arith.constant 0 : i32
    return %2, %c0_i32_0 : i32, i32
  }
  func.func @transform_2(%arg0: i32, %arg1: i32) -> (i32, i32) {
    %c0_i32 = arith.constant 0 : i32
    %c0_i32_0 = arith.constant 0 : i32
    %c0_i32_1 = arith.constant 0 : i32
    return %c0_i32, %c0_i32_0 : i32, i32
  }
  func.func @transform_3(%arg0: i32, %arg1: i32) -> (i32, i32) {
    %c0_i32 = arith.constant 0 : i32
    %c0_i32_0 = arith.constant 0 : i32
    return %arg0, %c0_i32 : i32, i32
  }
  func.func @transform_4(%arg0: i32, %arg1: i32) -> (i32, i32) {
    %c0_i32 = arith.constant 0 : i32
    %c0_i32_0 = arith.constant 0 : i32
    return %arg0, %c0_i32 : i32, i32
  }
}

</mosaic_0001>

<bundles_post_ra>
// kernel: tpu_custom_call.1
= control target key start
LH: loop header
LB: loop body
LE: loop exit
PB: predicated region body
PF: predicated region fallthrough
CT: control target
= control target key end

     0   :  { %10 = vsyncpa [#allocation3], 0  ;;  %s377_s0 = inlined_call_operand.hbm [shape: f32[32,128], index: 0, kind: input, shape index: {}]   ;;  %s378_s1 = inlined_call_operand.hbm [shape: f32[32,128], index: 1, kind: input, shape index: {}]   ;;  %s379_s2 = inlined_call_operand.vmem [shape: f32[4,128], index: 2, kind: input, shape index: {}]   ;;  %s380_s3 = inlined_call_operand.hbm [shape: f32[8,128], index: 3, kind: output, shape index: {0}]   ;;  %s381_s4 = inlined_call_operand.hbm [shape: f32[8,128], index: 4, kind: output, shape index: {1}]  }
   0x1   :  { %11 = vsyncpa [#allocation6], 0 }
   0x2   :  { %12 = vsyncpa [#allocation4], 0 }
   0x3   :  { %13 = vsyncpa [#allocation9], 0  ;;  %s292_s15 = smov [#allocation2]   ;;  %s196_s19 = scalar_lea.hbm %s377_s0, 512 }
   0x4   :  { %s25_s16 = sshll.u32 %s292_s15, 4  ;;  %p197_p0 = scmp.ne.s32.totalorder %s377_s0, %s196_s19  ;;  %s26_s16 = int_to_ptr.vmem [resolvable:$true] %s25_s16 }
   0x5   :  { %p200_p1 = scmp.lt.u32.totalorder %s196_s19, %s377_s0 }
   0x7   :  { %p202_p2 = pnand %p200_p1, %p197_p0 }
   0x9   :  { %205 = shalt.err (!%p202_p2)
}
   0xa   :  { %s206_s24 = scalar_lea.vmem %s26_s16, 512  ;;  %p211_p4 = scmp.lt.s32.totalorder %s26_s16, %s26_s16 }
   0xb   :  { %p207_p3 = scmp.ne.s32.totalorder %s26_s16, %s206_s24  ;;  %p212_p5 = scmp.lt.s32.totalorder %s206_s24, %s206_s24 }
   0xd   :  { %p213_p6 = por %p212_p5, %p211_p4 }
   0xf   :  { %p214_p7 = pnand %p213_p6, %p207_p3 }
  0x11   :  { %217 = shalt.err (!%p214_p7)
}
  0x12   :  { %s293_s25 = smov 128   ;;  %s294_s26 = smov 8  }
  0x13   :  { %31 = dma.hbm_to_vmem [thread:$0]  %s377_s0, 512, %s26_s16, [#allocation3], %s293_s25, %s293_s25, %s294_s26  }
  0x14   :  { %s295_s29 = smov [#allocation5]   ;;  %s218_s7 = scalar_lea.hbm %s378_s1, 512 }
  0x15   :  { %s43_s30 = sshll.u32 %s295_s29, 4  ;;  %p219_p8 = scmp.ne.s32.totalorder %s378_s1, %s218_s7  ;;  %s44_s30 = int_to_ptr.vmem [resolvable:$true] %s43_s30 }
  0x16   :  { %p222_p9 = scmp.lt.u32.totalorder %s218_s7, %s378_s1 }
  0x18   :  { %p224_p10 = pnand %p222_p9, %p219_p8 }
  0x1a   :  { %227 = shalt.err (!%p224_p10)
}
  0x1b   :  { %s228_s12 = scalar_lea.vmem %s44_s30, 512  ;;  %p233_p12 = scmp.lt.s32.totalorder %s44_s30, %s44_s30 }
  0x1c   :  { %p229_p11 = scmp.ne.s32.totalorder %s44_s30, %s228_s12  ;;  %p234_p13 = scmp.lt.s32.totalorder %s228_s12, %s228_s12 }
  0x1e   :  { %p235_p0 = por %p234_p13, %p233_p12 }
  0x20   :  { %p236_p1 = pnand %p235_p0, %p229_p11 }
  0x22   :  { %239 = shalt.err (!%p236_p1)
}
  0x23   :  { %49 = dma.hbm_to_vmem [thread:$0]  %s378_s1, 512, %s44_s30, [#allocation6], %s293_s25, %s293_s25, %s294_s26  }
  0x24   :  { %284 = dma.done.wait [#allocation3], 512  }
  0x25   :  { %285 = vsyncadd [#allocation3], 4294966784 }
  0x26   :  { %286 = dma.done.wait [#allocation6], 512  }
  0x27   :  { %287 = vsyncadd [#allocation6], 4294966784  ;;  %v98_v0 = vlaneseq  ;;  %v296_v2 = vmov 0.0   ;;  %v97_v4 = vld [vmem:[%s379_s2] sm:$0xf]  ;;  %vm104_vm1 = vcmask 1043456  }
  0x28   :  { %vm133_vm8 = vcmask 3072   ;;  %v72_v27 = vld [vmem:[#allocation2] sm:$0xff]  ;;  %v73_v28 = vld [vmem:[#allocation2 + $0x8] sm:$0xff]  ;;  %v74_v32 = vld [vmem:[#allocation2 + $0x10] sm:$0xff]  ;;  %s297_s1 = smov [#allocation7]  }
  0x29   :  { %v99_v1 = vshrl.u32 %v98_v0, 7  ;;  %v76_v29 = vld [vmem:[#allocation5] sm:$0xff]  ;;  %v77_v30 = vld [vmem:[#allocation5 + $0x8] sm:$0xff]  ;;  %v78_v33 = vld [vmem:[#allocation5 + $0x10] sm:$0xff]  ;;  %s156_s2 = sshll.u32 %s297_s1, 4  ;;  %s157_s2 = int_to_ptr.vmem [resolvable:$true] %s156_s2 }
  0x2a   :  { %v80_v31 = vsub.f32 %v72_v27, %v76_v29  ;;  %v81_v34 = vsub.f32 %v73_v28, %v77_v30  ;;  %v82_v35 = vsub.f32 %v74_v32, %v78_v33  ;;  %v75_v37 = vld [vmem:[#allocation2 + $0x18] sm:$0xff]  ;;  %s240_s16 = scalar_lea.vmem %s157_s2, 128  ;;  %p245_p3 = scmp.lt.s32.totalorder %s157_s2, %s157_s2 }
  0x2b   :  { %vm100_vm0 = vcmp.ge.s32.totalorder %v99_v1, 2  ;;  %vm128_vm7 = vcmp.lt.s32.totalorder %v99_v1, 2  ;;  %v79_v38 = vld [vmem:[#allocation5 + $0x18] sm:$0xff]  ;;  %p241_p2 = scmp.ne.s32.totalorder %s157_s2, %s240_s16  ;;  %p246_p4 = scmp.lt.s32.totalorder %s240_s16, %s240_s16 }
  0x2c   :  { %v184_v3 = vsel %vm100_vm0, 1.0, %v296_v2  ;;  %v84_v36 = vmul.f32 %v80_v31, %v80_v31  ;;  %v85_v39 = vmul.f32 %v81_v34, %v81_v34  ;;  %v83_v40 = vsub.f32 %v75_v37, %v79_v38 }
  0x2d   :  { %v103_v5 = vmul.f32 %v184_v3, %v97_v4  ;;  %v86_v41 = vmul.f32 %v82_v35, %v82_v35  ;;  %p247_p5 = por %p246_p4, %p245_p3 }
  0x2e   :  { %v89_v42 = vadd.f32 %v85_v39, %v84_v36  ;;  %v87_v43 = vmul.f32 %v83_v40, %v83_v40 }
  0x2f   :  { %v105_v6 = vsel %vm104_vm1, %v103_v5, 0.0  ;;  %p248_p6 = pnand %p247_p5, %p241_p2 }
  0x30   :  { %v106_v7 = vrot.slane %v105_v6, 4  ;;  %v90_v44 = vadd.f32 %v89_v42, %v86_v41 }
  0x32   :  { %v107_v8 = vadd.f32 %v106_v7, %v105_v6  ;;  %v91_v45 = vadd.f32 %v90_v44, %v87_v43 }
  0x34   :  { %v108_v9 = vrot.slane %v107_v8, 2  ;;  %93 = vst [vmem:[#allocation7] sm:$0xff] %v91_v45 }
  0x36   :  { %v109_v10 = vadd.f32 %v108_v9, %v107_v8 }
  0x38   :  { %v110_v11 = vrot.slane %v109_v10, 1 }
  0x3a   :  { %v111_v12 = vadd.f32 %v110_v11, %v109_v10 }
  0x3c   :  { %v112_v13 = vmul.f32 0.5, %v111_v12 }
  0x3e   :  { %v113_v14 = vand.u32 2147483647, %v112_v13  ;;  %vm115_vm2 = vcmp.lt.f32.partialorder %v112_v13, 0.0 }
  0x40   :  { %vm114_vm3 = vcmp.lt.f32.partialorder %v113_v14, 0.1 }
  0x41   :  { %vm116_vm4 = vmand %vm114_vm3, %vm115_vm2 }
  0x42   :  { %v117_v15 = vsel %vm116_vm4, -0.1, %v112_v13 }
  0x43   :  { %vm118_vm5 = vcmp.gt.f32.partialorder %v117_v15, 0.0 }
  0x44   :  { %vm119_vm6 = vmand %vm114_vm3, %vm118_vm5 }
  0x45   :  { %v120_v16 = vsel %vm119_vm6, 0.1, %v117_v15 }
  0x46   :  { %v121_v17 = vsub.f32 %v97_v4, %v120_v16 }
  0x48   :  { %v122_v18 = vmul.f32 %v121_v17, %v121_v17 }
  0x4a   :  { %v123_v19 = vsel %vm104_vm1, %v122_v18, 0.0 }
  0x4b   :  { %124 = vadd.xlane.f32.xlu0 %v123_v19 }
  0xd8   :  { %v125_v20 = vpop.xlane.xlu0 %124 }
  0xd9   :  { %v127_v21 = vmul.f32 0.0078125, %v125_v20 }
  0xdb   :  { %v129_v22 = vadd.f32 1e-06, %v127_v21 }
  0xdd   :  { %194 = vrcp.f32 %v129_v22 }
  0xe7   :  { %v195_v23 = vpop.eup %194 }
  0xe8   :  { %v131_v24 = vmul.f32 0.1, %v195_v23 }
  0xea   :  { %v132_v25 = vsel %vm128_vm7, %v131_v24, %v127_v21 }
  0xeb   :  { %v134_v26 = vsel %vm133_vm8, %v132_v25, 0.0 }
  0xec   :  { %135 = vadd.xlane.f32.xlu0 %v134_v26 }
  0xed   :  { %251 = shalt.err (!%p248_p6)
}
  0xee   :  { %s252_s19 = scalar_lea.hbm %s380_s3, 128 }
  0xef   :  { %p253_p7 = scmp.ne.s32.totalorder %s380_s3, %s252_s19  ;;  %p256_p8 = scmp.lt.u32.totalorder %s252_s19, %s380_s3 }
  0xf1   :  { %p258_p9 = pnand %p256_p8, %p253_p7 }
  0xf3   :  { %261 = shalt.err (!%p258_p9)
}
  0xf4   :  { %159 = dma.vmem_to_hbm [thread:$0]  %s157_s2, 128, %s380_s3, [#allocation4]  }
  0xf5   :  { %s298_s26 = smov [#allocation8]  }
  0xf6   :  { %s166_s27 = sshll.u32 %s298_s26, 4  ;;  %s167_s27 = int_to_ptr.vmem [resolvable:$true] %s166_s27 }
  0xf7   :  { %s262_s30 = scalar_lea.vmem %s167_s27, 128  ;;  %p267_p11 = scmp.lt.s32.totalorder %s167_s27, %s167_s27 }
  0xf8   :  { %p263_p10 = scmp.ne.s32.totalorder %s167_s27, %s262_s30  ;;  %p268_p12 = scmp.lt.s32.totalorder %s262_s30, %s262_s30 }
  0xfa   :  { %p269_p13 = por %p268_p12, %p267_p11 }
  0xfc   :  { %p270_p0 = pnand %p269_p13, %p263_p10 }
 0x179   :  { %v136_v46 = vpop.xlane.xlu0 %135 }
 0x17a   :  { %v137_v47 = vrot.slane %v136_v46, 4 }
 0x17c   :  { %v138_v48 = vadd.f32 %v137_v47, %v136_v46 }
 0x17e   :  { %v139_v49 = vrot.slane %v138_v48, 2 }
 0x180   :  { %v140_v50 = vadd.f32 %v139_v49, %v138_v48 }
 0x182   :  { %v141_v51 = vrot.slane %v140_v50, 1 }
 0x184   :  { %v142_v52 = vadd.f32 %v141_v51, %v140_v50 }
 0x186   :  { %185 = vpush %v142_v52 }
 0x1b7   :  { %s186_s28 = spop %185 }
 0x1b8   :  { %s146_s29 = smul.f32 0.25, %s186_s28 }
 0x1ba   :  { %v147_v53 = vstv %s146_s29 }
 0x1bb   :  { %149 = vst [vmem:[#allocation8] sm:$0xff] %v147_v53 }
 0x1bc   :  { %273 = shalt.err (!%p270_p0)
}
 0x1bd   :  { %s274_s6 = scalar_lea.hbm %s381_s4, 128 }
 0x1be   :  { %p275_p1 = scmp.ne.s32.totalorder %s381_s4, %s274_s6  ;;  %p278_p2 = scmp.lt.u32.totalorder %s274_s6, %s381_s4 }
 0x1c0   :  { %p280_p3 = pnand %p278_p2, %p275_p1 }
 0x1c2   :  { %283 = shalt.err (!%p280_p3)
}
 0x1c3   :  { %169 = dma.vmem_to_hbm [thread:$0]  %s167_s27, 128, %s381_s4, [#allocation9]  }
 0x1c4   :  { %288 = dma.done.wait [#allocation4], 128  }
 0x1c5   :  { %289 = vsyncadd [#allocation4], 4294967168 }
 0x1c6   :  { %290 = dma.done.wait [#allocation9], 128  }
 0x1c7   :  { %291 = vsyncadd [#allocation9], 4294967168 }
 0x1c8   :  { %176 = vsyncpa [#allocation3], 1 }
 0x1c9   :  { %177 = vsyncpa [#allocation6], 1 }
 0x1ca   :  { %178 = vsyncpa [#allocation4], 1 }
 0x1cb   :  { %179 = vsyncpa [#allocation9], 1 }

</bundles_post_ra>
